<compile_context>
chip_gen: v7x
topology: tpu7x:2x2x1
jax: 0.10.0
libtpu: 0.0.40
codegen_flags: <defaults>
</compile_context>

<pallas_src>
import functools
import math

import numpy as np
import jax
import jax.numpy as jnp
from jax import lax
from jax.experimental import pallas as pl
from jax.experimental.pallas import tpu as pltpu

LANE = 128
SUBLANE = 8


# ----------------------------- parameter setup ------------------------------

def init_params(key, input_dim, oc):
    """Deterministic init with PyTorch-like shapes (Conv2d/Linear/Conv1d)."""
    P = math.ceil(math.sqrt(input_dim)) ** 2
    oc2 = oc // 2
    ks = jax.random.split(key, 10)

    def U(k, shape, fan_in):
        b = 1.0 / math.sqrt(fan_in)
        return jax.random.uniform(k, shape, jnp.float32, -b, b)

    return {
        "w1": U(ks[0], (oc2, 1, 3, 3), 1 * 9),
        "b1": U(ks[1], (oc2,), 1 * 9),
        "w2": U(ks[2], (oc, oc2, 3, 3), oc2 * 9),
        "b2": U(ks[3], (oc,), oc2 * 9),
        "w3": U(ks[4], (oc, oc, 3, 3), oc * 9),
        "b3": U(ks[5], (oc,), oc * 9),
        "wfc": U(ks[6], (oc * input_dim, oc * P), oc * P),
        "bfc": U(ks[7], (oc * input_dim,), oc * P),
        "wconv": U(ks[8], (1, oc, 1), oc),
        "bconv": U(ks[9], (1,), oc),
    }


def _conv3x3_to_dense(w, s):
    """3x3 'SAME' conv weight (Cout, Cin, 3, 3) acting on an s x s image ->
    dense M of shape (Cin*s*s, Cout*s*s) such that out_flat = in_flat @ M,
    with both flats in PyTorch NCHW flatten order (c*s*s + i*s + j)."""
    w = np.asarray(w, dtype=np.float32)
    c_out, c_in = w.shape[0], w.shape[1]
    P = s * s
    M = np.zeros((c_in * P, c_out * P), dtype=np.float32)
    for co in range(c_out):
        for ci in range(c_in):
            for oi in range(s):
                for oj in range(s):
                    p = oi * s + oj
                    for di in range(3):
                        for dj in range(3):
                            ii, jj = oi + di - 1, oj + dj - 1
                            if 0 <= ii < s and 0 <= jj < s:
                                q = ii * s + jj
                                M[ci * P + q, co * P + p] += w[co, ci, di, dj]
    return M


def prepare_operators(params, input_dim, oc):
    """Build the packed weight/bias slabs ONCE (host-side numpy).

    Returns {"W": (4, S, S) f32, "b": (4, 1, S) f32} with
      W[0] = conv1-as-dense, W[1] = conv2, W[2] = conv3,
      W[3] = fc_out with the 1x1 Conv1d folded in.
    All padding is exact zeros (required for the padded-lane exactness
    argument: relu(0 + 0) = 0 feeds only zero rows of the next operator).
    """
    assert oc % 2 == 0, "output_channels must be even (conv2d_1 uses oc // 2)"
    P = math.ceil(math.sqrt(input_dim)) ** 2
    s = int(math.sqrt(P))
    D = input_dim

    w = {k: np.asarray(v, dtype=np.float32) for k, v in params.items()}

    W1 = _conv3x3_to_dense(w["w1"], s)                      # (P,     oc2*P)
    b1 = np.repeat(w["b1"], P)[None, :]                     # (1, oc2*P)
    W2 = _conv3x3_to_dense(w["w2"], s)                      # (oc2*P, oc*P)
    b2 = np.repeat(w["b2"], P)[None, :]
    W3 = _conv3x3_to_dense(w["w3"], s)                      # (oc*P,  oc*P)
    b3 = np.repeat(w["b3"], P)[None, :]

    # Fold the 1x1 Conv1d (block-diagonal operator Wc) into the FC layer.
    # Exact: there is no nonlinearity between fc_out and the Conv1d.
    Wc = np.kron(w["wconv"][0, :, 0].reshape(oc, 1),
                 np.eye(D, dtype=np.float32))               # (oc*D, D)
    Wfc = w["wfc"].T @ Wc                                   # (oc*P, D)
    bfc = w["bfc"][None, :] @ Wc + w["bconv"].reshape(1, 1)  # (1, D)

    mats = [W1, W2, W3, Wfc]
    biases = [b1, b2, b3, bfc]

    # Uniform slab side: max over all operator dims, rounded up to 128 lanes.
    S = max(max(m.shape[0] for m in mats), max(m.shape[1] for m in mats))
    S = ((max(S, LANE) + LANE - 1) // LANE) * LANE

    Wslab = np.zeros((4, S, S), dtype=np.float32)
    bslab = np.zeros((4, 1, S), dtype=np.float32)   # padded entries stay 0
    for i, (m, b) in enumerate(zip(mats, biases)):
        Wslab[i, :m.shape[0], :m.shape[1]] = m
        bslab[i, :, :b.shape[1]] = b

    return {"W": jnp.asarray(Wslab), "b": jnp.asarray(bslab)}


# --------------------------------- kernel -----------------------------------

def _fused_kernel(x_ref, w_ref, b_ref, out_ref):
    # x_ref:   (TB, S)   zero-padded, lane-dense input rows
    # w_ref:   (4, S, S) packed dense operators (conv1, conv2, conv3, fused fc)
    # b_ref:   (4, 1, S) packed biases (padded entries exactly 0)
    # out_ref: (TB, S)   lane-dense output tile (full, unmasked store)
    h = x_ref[...]
    for i in range(3):                               # conv1/conv2/conv3 + ReLU
        h = jnp.maximum(
            jnp.dot(h, w_ref[i], preferred_element_type=jnp.float32)
            + b_ref[i], 0.0)
    # fc_out with the 1x1 Conv1d folded in (no ReLU on the final layer).
    out_ref[...] = (
        jnp.dot(h, w_ref[3], preferred_element_type=jnp.float32) + b_ref[3])


# -------------------------------- wrappers ----------------------------------

@functools.partial(jax.jit, static_argnames=("input_dim",))
def forward_pallas(ops, x, input_dim):
    B = x.shape[0]
    D = input_dim
    wslab, bslab = ops["W"], ops["b"]
    S = wslab.shape[1]                 # uniform padded operator side (>= 128)

    # Batch tile. For throughput, callers should stack many rows per call
    # (B >= 128); the row-tile grid then shards across v7x's two TensorCores.
    TB = 8 if B <= 256 else 128
    B_pad = ((B + TB - 1) // TB) * TB
    nb = B_pad // TB

    # Single glue op: zero (B_pad, S) slab with x in the top-left corner.
    # Columns D..P-1 MUST be zero (the module's F.pad); columns >= P hit only
    # zero rows of W1, and padded batch rows are sliced off below.
    xf = jnp.zeros((B_pad, S), jnp.float32).at[:B, :D].set(
        x.reshape(B, D).astype(jnp.float32))

    flops = 2 * B_pad * 4 * S * S
    bytes_accessed = 4 * (2 * B_pad * S + int(wslab.size) + int(bslab.size))

    out = pl.pallas_call(
        _fused_kernel,
        out_shape=jax.ShapeDtypeStruct((B_pad, S), jnp.float32),
        grid=(nb,),
        in_specs=[
            pl.BlockSpec((TB, S), lambda i: (i, 0)),        # x rows
            pl.BlockSpec((4, S, S), lambda i: (0, 0, 0)),   # weight slab (resident)
            pl.BlockSpec((4, 1, S), lambda i: (0, 0, 0)),   # bias slab (resident)
        ],
        out_specs=pl.BlockSpec((TB, S), lambda i: (i, 0)),
        compiler_params=pltpu.CompilerParams(
            dimension_semantics=("parallel",),
            allow_input_fusion=[True, False, False]),
        cost_estimate=pl.CostEstimate(flops=flops, transcendentals=0,
                                      bytes_accessed=bytes_accessed),
    )(xf, wslab, bslab)
    return out[:B, :D].reshape(B, 1, D)


def forward_reference(params, x, input_dim, oc):
    """Pure-JAX reference matching the PyTorch forward op-for-op."""
    B = x.shape[0]
    padded_dim = math.ceil(math.sqrt(input_dim)) ** 2
    s = int(math.sqrt(padded_dim))
    hp = lax.Precision.HIGHEST
    xp = jnp.pad(x, ((0, 0), (0, 0), (0, padded_dim - input_dim)))
    h = xp.reshape(B, 1, s, s)
    dn = ("NCHW", "OIHW", "NCHW")

    def conv(h, w, b):
        y = lax.conv_general_dilated(h, w, (1, 1), [(1, 1), (1, 1)],
                                     dimension_numbers=dn, precision=hp)
        return jax.nn.relu(y + b.reshape(1, -1, 1, 1))

    h = conv(h, params["w1"], params["b1"])
    h = conv(h, params["w2"], params["b2"])
    h = conv(h, params["w3"], params["b3"])
    h = h.reshape(B, -1)
    y = jnp.dot(h, params["wfc"].T, precision=hp) + params["bfc"]
    y = y.reshape(B, oc, input_dim)
    out = jnp.einsum("oc,bct->bot", params["wconv"][:, :, 0], y, precision=hp)
    return out + params["bconv"].reshape(1, 1, 1)


# ---------------------------------- main -------------------------------------

if __name__ == "__main__":
    key = jax.random.PRNGKey(0)
    input_dim, output_channels, batch = 14, 8, 2  # padded_dim = 16 -> 4x4 image

    pkey, xkey = jax.random.split(key)
    params = init_params(pkey, input_dim, output_channels)
    x = jax.random.normal(xkey, (batch, 1, input_dim), jnp.float32)

    # Build the packed operator slabs once (host side), then call the kernel.
    ops = prepare_operators(params, input_dim, output_channels)
    out = jax.block_until_ready(forward_pallas(ops, x, input_dim))

    ref = forward_reference(params, x, input_dim, output_channels)
    assert out.shape == (batch, 1, input_dim), out.shape
    np.testing.assert_allclose(np.asarray(out), np.asarray(ref),
                               rtol=1e-4, atol=1e-4)
    print("KERNEL_OK")
</pallas_src>

<mosaic_0001>
module attributes {stable_mosaic.version = 11 : i64} {
  func.func @_fused_kernel(%arg0: i32, %arg1: memref<8x128xf32, #tpu.memory_space<vmem>>, %arg2: memref<4x128x128xf32, #tpu.memory_space<vmem>>, %arg3: memref<4x1x128xf32, #tpu.memory_space<vmem>>, %arg4: memref<8x128xf32, #tpu.memory_space<vmem>>) attributes {dimension_semantics = [#tpu.dimension_semantics<parallel>], iteration_bounds = array<i64: 1>, scalar_prefetch = 0 : i64, scratch_operands = 0 : i64, tpu.core_type = #tpu.core_type<tc>, window_params = [{transform_indices = @transform_0, window_bounds = array<i64: 8, 128>}, {pipeline_mode = #tpu.pipeline_mode<synchronous>, transform_indices = @transform_1, window_bounds = array<i64: 4, 128, 128>}, {pipeline_mode = #tpu.pipeline_mode<synchronous>, transform_indices = @transform_2, window_bounds = array<i64: 4, 1, 128>}, {transform_indices = @transform_3, window_bounds = array<i64: 8, 128>}]} {
    %c0 = arith.constant 0 : index
    %c0_0 = arith.constant 0 : index
    %0 = vector.load %arg1[%c0, %c0_0] : memref<8x128xf32, #tpu.memory_space<vmem>>, vector<8x128xf32>
    %c0_1 = arith.constant 0 : index
    %c0_2 = arith.constant 0 : index
    %c0_3 = arith.constant 0 : index
    %1 = vector.load %arg2[%c0_1, %c0_2, %c0_3] : memref<4x128x128xf32, #tpu.memory_space<vmem>>, vector<1x128x128xf32>
    %2 = vector.shape_cast %1 : vector<1x128x128xf32> to vector<128x128xf32>
    %cst = arith.constant dense<0.000000e+00> : vector<8x128xf32>
    %3 = tpu.matmul %0, %2, %cst {dimension_numbers = #tpu.dot_dimension_numbers<[1], [0], [0], [1], [0, 0, 1, 1], [], []>} : vector<8x128xf32>, vector<128x128xf32>, vector<8x128xf32> -> vector<8x128xf32>
    %c0_4 = arith.constant 0 : index
    %c0_5 = arith.constant 0 : index
    %c0_6 = arith.constant 0 : index
    %4 = vector.load %arg3[%c0_4, %c0_5, %c0_6] : memref<4x1x128xf32, #tpu.memory_space<vmem>>, vector<1x1x128xf32>
    %5 = vector.shape_cast %4 : vector<1x1x128xf32> to vector<1x128xf32>
    %6 = vector.broadcast %5 : vector<1x128xf32> to vector<8x128xf32>
    %7 = arith.addf %3, %6 : vector<8x128xf32>
    %cst_7 = arith.constant 0.000000e+00 : f32
    %8 = vector.broadcast %cst_7 : f32 to vector<8x128xf32>
    %9 = arith.maximumf %7, %8 : vector<8x128xf32>
    %c1 = arith.constant 1 : index
    %c0_8 = arith.constant 0 : index
    %c0_9 = arith.constant 0 : index
    %10 = vector.load %arg2[%c1, %c0_8, %c0_9] : memref<4x128x128xf32, #tpu.memory_space<vmem>>, vector<1x128x128xf32>
    %11 = vector.shape_cast %10 : vector<1x128x128xf32> to vector<128x128xf32>
    %cst_10 = arith.constant dense<0.000000e+00> : vector<8x128xf32>
    %12 = tpu.matmul %9, %11, %cst_10 {dimension_numbers = #tpu.dot_dimension_numbers<[1], [0], [0], [1], [0, 0, 1, 1], [], []>} : vector<8x128xf32>, vector<128x128xf32>, vector<8x128xf32> -> vector<8x128xf32>
    %c1_11 = arith.constant 1 : index
    %c0_12 = arith.constant 0 : index
    %c0_13 = arith.constant 0 : index
    %13 = vector.load %arg3[%c1_11, %c0_12, %c0_13] : memref<4x1x128xf32, #tpu.memory_space<vmem>>, vector<1x1x128xf32>
    %14 = vector.shape_cast %13 : vector<1x1x128xf32> to vector<1x128xf32>
    %15 = vector.broadcast %14 : vector<1x128xf32> to vector<8x128xf32>
    %16 = arith.addf %12, %15 : vector<8x128xf32>
    %cst_14 = arith.constant 0.000000e+00 : f32
    %17 = vector.broadcast %cst_14 : f32 to vector<8x128xf32>
    %18 = arith.maximumf %16, %17 : vector<8x128xf32>
    %c2 = arith.constant 2 : index
    %c0_15 = arith.constant 0 : index
    %c0_16 = arith.constant 0 : index
    %19 = vector.load %arg2[%c2, %c0_15, %c0_16] : memref<4x128x128xf32, #tpu.memory_space<vmem>>, vector<1x128x128xf32>
    %20 = vector.shape_cast %19 : vector<1x128x128xf32> to vector<128x128xf32>
    %cst_17 = arith.constant dense<0.000000e+00> : vector<8x128xf32>
    %21 = tpu.matmul %18, %20, %cst_17 {dimension_numbers = #tpu.dot_dimension_numbers<[1], [0], [0], [1], [0, 0, 1, 1], [], []>} : vector<8x128xf32>, vector<128x128xf32>, vector<8x128xf32> -> vector<8x128xf32>
    %c2_18 = arith.constant 2 : index
    %c0_19 = arith.constant 0 : index
    %c0_20 = arith.constant 0 : index
    %22 = vector.load %arg3[%c2_18, %c0_19, %c0_20] : memref<4x1x128xf32, #tpu.memory_space<vmem>>, vector<1x1x128xf32>
    %23 = vector.shape_cast %22 : vector<1x1x128xf32> to vector<1x128xf32>
    %24 = vector.broadcast %23 : vector<1x128xf32> to vector<8x128xf32>
    %25 = arith.addf %21, %24 : vector<8x128xf32>
    %cst_21 = arith.constant 0.000000e+00 : f32
    %26 = vector.broadcast %cst_21 : f32 to vector<8x128xf32>
    %27 = arith.maximumf %25, %26 : vector<8x128xf32>
    %c3 = arith.constant 3 : index
    %c0_22 = arith.constant 0 : index
    %c0_23 = arith.constant 0 : index
    %28 = vector.load %arg2[%c3, %c0_22, %c0_23] : memref<4x128x128xf32, #tpu.memory_space<vmem>>, vector<1x128x128xf32>
    %29 = vector.shape_cast %28 : vector<1x128x128xf32> to vector<128x128xf32>
    %cst_24 = arith.constant dense<0.000000e+00> : vector<8x128xf32>
    %30 = tpu.matmul %27, %29, %cst_24 {dimension_numbers = #tpu.dot_dimension_numbers<[1], [0], [0], [1], [0, 0, 1, 1], [], []>} : vector<8x128xf32>, vector<128x128xf32>, vector<8x128xf32> -> vector<8x128xf32>
    %c3_25 = arith.constant 3 : index
    %c0_26 = arith.constant 0 : index
    %c0_27 = arith.constant 0 : index
    %31 = vector.load %arg3[%c3_25, %c0_26, %c0_27] : memref<4x1x128xf32, #tpu.memory_space<vmem>>, vector<1x1x128xf32>
    %32 = vector.shape_cast %31 : vector<1x1x128xf32> to vector<1x128xf32>
    %33 = vector.broadcast %32 : vector<1x128xf32> to vector<8x128xf32>
    %34 = arith.addf %30, %33 : vector<8x128xf32>
    %c0_28 = arith.constant 0 : index
    %c0_29 = arith.constant 0 : index
    %35 = vector.load %arg4[%c0_28, %c0_29] : memref<8x128xf32, #tpu.memory_space<vmem>>, vector<8x128xf32>
    tpu.vector_store %arg4[%c0_28, %c0_29], %34 {strides = array<i32>} : memref<8x128xf32, #tpu.memory_space<vmem>>, vector<8x128xf32>,
    return
  }
  func.func @transform_0(%arg0: i32) -> (i32, i32) {
    %c0_i32 = arith.constant 0 : i32
    %c0_i32_0 = arith.constant 0 : i32
    return %arg0, %c0_i32 : i32, i32
  }
  func.func @transform_1(%arg0: i32) -> (i32, i32, i32) {
    %c0_i32 = arith.constant 0 : i32
    %c0_i32_0 = arith.constant 0 : i32
    %c0_i32_1 = arith.constant 0 : i32
    %c0_i32_2 = arith.constant 0 : i32
    return %c0_i32, %c0_i32_0, %c0_i32_1 : i32, i32, i32
  }
  func.func @transform_2(%arg0: i32) -> (i32, i32, i32) {
    %c0_i32 = arith.constant 0 : i32
    %c0_i32_0 = arith.constant 0 : i32
    %c0_i32_1 = arith.constant 0 : i32
    %c0_i32_2 = arith.constant 0 : i32
    return %c0_i32, %c0_i32_0, %c0_i32_1 : i32, i32, i32
  }
  func.func @transform_3(%arg0: i32) -> (i32, i32) {
    %c0_i32 = arith.constant 0 : i32
    %c0_i32_0 = arith.constant 0 : i32
    return %arg0, %c0_i32 : i32, i32
  }
}

</mosaic_0001>

<bundles_post_ra>
// kernel: forward_pallas.2
= control target key start
LH: loop header
LB: loop body
LE: loop exit
PB: predicated region body
PF: predicated region fallthrough
CT: control target
= control target key end

     0   :  { %s884_s0 = inlined_call_operand.hbm [shape: f32[4,128,128], index: 0, kind: input, shape index: {}]   ;;  %s885_s1 = inlined_call_operand.vmem [shape: f32[4,1,128], index: 1, kind: input, shape index: {}]   ;;  %s886_s2 = inlined_call_operand.vmem [shape: f32[2,14], index: 2, kind: input, shape index: {}]   ;;  %s887_s3 = inlined_call_operand.<no memory space> [shape: f32[], index: 3, kind: input, shape index: {}]   ;;  %s888_s4 = inlined_call_operand.vmem [shape: f32[8,128], index: 4, kind: output, shape index: {}]  }
   0x1   :  { %v9_v0 = vstv %s887_s3 }
   0x2   :  { %10 = vsyncpa [#allocation8], 0  ;;  %s772_s17 = smov [#allocation7]   ;;  %s748_s21 = scalar_lea.hbm %s884_s0, 8192 }
   0x3   :  { %s18_s18 = sshll.u32 %s772_s17, 4  ;;  %p749_p0 = scmp.ne.s32.totalorder %s884_s0, %s748_s21  ;;  %s19_s18 = int_to_ptr.vmem [resolvable:$true] %s18_s18 }
   0x4   :  { %p752_p1 = scmp.lt.u32.totalorder %s748_s21, %s884_s0 }
   0x6   :  { %p754_p2 = pnand %p752_p1, %p749_p0 }
   0x8   :  { %757 = shalt.err (!%p754_p2)
}
   0x9   :  { %s758_s26 = scalar_lea.vmem %s19_s18, 8192  ;;  %p763_p4 = scmp.lt.s32.totalorder %s19_s18, %s19_s18 }
   0xa   :  { %p759_p3 = scmp.ne.s32.totalorder %s19_s18, %s758_s26  ;;  %p764_p5 = scmp.lt.s32.totalorder %s758_s26, %s758_s26 }
   0xc   :  { %p765_p6 = por %p764_p5, %p763_p4 }
   0xe   :  { %p766_p7 = pnand %p765_p6, %p759_p3 }
  0x10   :  { %769 = shalt.err (!%p766_p7)
}
  0x11   :  { %s773_s27 = smov 128   ;;  %s774_s28 = smov 8  }
  0x12   :  { %24 = dma.hbm_to_vmem [thread:$0]  %s884_s0, 8192, %s19_s18, [#allocation8], %s773_s27, %s773_s27, %s774_s28  }
  0x13   :  { %770 = dma.done.wait [#allocation8], 8192  }
  0x14   :  { %771 = vsyncadd [#allocation8], 4294959104  ;;  %v775_v1 = vmov 0.0|0.0   ;;  %vm776_vm0 = vmmov 0   ;;  %v777_v2 = vmov 0.0   ;;  %v44_v3 = vld [vmem:[#allocation7] sm:$0xff]  ;;  %v31_v31 = vlaneseq }
  0x15   :  { %646 = vmatprep.subr.bf16.mxu0 %v775_v1  ;;  %538 = vmatprep.mubr.msk.f32.mxu0 %vm776_vm0, %v777_v2  ;;  %v45_v4 = vld [vmem:[#allocation7 + $0x8] sm:$0xff]  ;;  %v46_v5 = vld [vmem:[#allocation7 + $0x10] sm:$0xff]  ;;  %v47_v7 = vld [vmem:[#allocation7 + $0x18] sm:$0xff] }
  0x16   :  { %670 = vmatprep.subr.bf16.mxu1 %v775_v1  ;;  %573 = vmatprep.mubr.msk.f32.mxu1 %vm776_vm0, %v777_v2  ;;  %v647_v6 = vpack.c.bf16 %v45_v4, %v44_v3  ;;  %v650_v8 = vpack.c.bf16 %v47_v7, %v46_v5  ;;  %v48_v9 = vld [vmem:[#allocation7 + $0x20] sm:$0xff]  ;;  %v49_v10 = vld [vmem:[#allocation7 + $0x28] sm:$0xff]  ;;  %v141_v13 = vld [vmem:[#allocation7 + $0x90] sm:$0xff]  ;;  %v32_v38 = vshrl.u32 %v31_v31, 7  ;;  %v37_v45 = vand.u32 127, %v31_v31 }
  0x17   :  { %v139_v11 = vld [vmem:[#allocation7 + $0x80] sm:$0xff]  ;;  %v140_v12 = vld [vmem:[#allocation7 + $0x88] sm:$0xff]  ;;  %v142_v14 = vld [vmem:[#allocation7 + $0x98] sm:$0xff]  ;;  %v653_v15 = vpack.c.bf16 %v49_v10, %v48_v9 }
  0x18   :  { %648 = vmatpush3.bf16.msra.mxu0 %v647_v6  ;;  %v671_v16 = vpack.c.bf16 %v140_v12, %v139_v11  ;;  %v50_v17 = vld [vmem:[#allocation7 + $0x30] sm:$0xff]  ;;  %v51_v18 = vld [vmem:[#allocation7 + $0x38] sm:$0xff]  ;;  %v674_v19 = vpack.c.bf16 %v142_v14, %v141_v13  ;;  %v143_v20 = vld [vmem:[#allocation7 + $0xa0] sm:$0xff]  ;;  %vm34_vm1 = vcmp.lt.s32.totalorder %v32_v38, 2  ;;  %vm39_vm2 = vcmp.lt.s32.totalorder %v37_v45, 14 }
  0x19   :  { %649 = vmatprep.subr.bf16.mxu0 %v775_v1  ;;  %v144_v21 = vld [vmem:[#allocation7 + $0xa8] sm:$0xff]  ;;  %v656_v22 = vpack.c.bf16 %v51_v18, %v50_v17  ;;  %v52_v23 = vld [vmem:[#allocation7 + $0x40] sm:$0xff]  ;;  %v145_v26 = vld [vmem:[#allocation7 + $0xb0] sm:$0xff] }
  0x1a   :  { %672 = vmatpush3.bf16.msra.mxu1 %v671_v16  ;;  %v53_v24 = vld [vmem:[#allocation7 + $0x48] sm:$0xff]  ;;  %v677_v25 = vpack.c.bf16 %v144_v21, %v143_v20  ;;  %v146_v27 = vld [vmem:[#allocation7 + $0xb8] sm:$0xff]  ;;  %v54_v29 = vld [vmem:[#allocation7 + $0x50] sm:$0xff] }
  0x1b   :  { %673 = vmatprep.subr.bf16.mxu1 %v775_v1  ;;  %v659_v28 = vpack.c.bf16 %v53_v24, %v52_v23  ;;  %v55_v30 = vld [vmem:[#allocation7 + $0x58] sm:$0xff]  ;;  %v680_v32 = vpack.c.bf16 %v146_v27, %v145_v26  ;;  %v147_v33 = vld [vmem:[#allocation7 + $0xc0] sm:$0xff]  ;;  %v148_v34 = vld [vmem:[#allocation7 + $0xc8] sm:$0xff] }
  0x1c   :  { %651 = vmatpush3.bf16.msra.mxu0 %v650_v8  ;;  %v662_v35 = vpack.c.bf16 %v55_v30, %v54_v29  ;;  %v56_v36 = vld [vmem:[#allocation7 + $0x60] sm:$0xff]  ;;  %v57_v37 = vld [vmem:[#allocation7 + $0x68] sm:$0xff]  ;;  %v683_v39 = vpack.c.bf16 %v148_v34, %v147_v33  ;;  %v149_v40 = vld [vmem:[#allocation7 + $0xd0] sm:$0xff] }
  0x1d   :  { %652 = vmatprep.subr.bf16.mxu0 %v775_v1  ;;  %v150_v41 = vld [vmem:[#allocation7 + $0xd8] sm:$0xff]  ;;  %v665_v42 = vpack.c.bf16 %v57_v37, %v56_v36  ;;  %v58_v43 = vld [vmem:[#allocation7 + $0x70] sm:$0xff]  ;;  %v30_v46 = vld [vmem:[%s886_s2] sm:$0x3] }
  0x1e   :  { %675 = vmatpush3.bf16.msra.mxu1 %v674_v19  ;;  %v59_v44 = vld [vmem:[#allocation7 + $0x78] sm:$0xff]  ;;  %v686_v47 = vpack.c.bf16 %v150_v41, %v149_v40  ;;  %v151_v48 = vld [vmem:[#allocation7 + $0xe0] sm:$0xff]  ;;  %v152_v49 = vld [vmem:[#allocation7 + $0xe8] sm:$0xff]  ;;  %v35_v51 = vsel %vm34_vm1, %v30_v46, %v9_v0 }
  0x1f   :  { %676 = vmatprep.subr.bf16.mxu1 %v775_v1  ;;  %v668_v50 = vpack.c.bf16 %v59_v44, %v58_v43  ;;  %v689_v52 = vpack.c.bf16 %v152_v49, %v151_v48  ;;  %v40_v53 = vsel %vm39_vm2, %v35_v51, %v9_v0  ;;  %v153_v54 = vld [vmem:[#allocation7 + $0xf0] sm:$0xff]  ;;  %v154_v55 = vld [vmem:[#allocation7 + $0xf8] sm:$0xff]  ;;  %v235_v57 = vld [vmem:[#allocation7 + $0x100] sm:$0xff] }
  0x20   :  { %654 = vmatpush3.bf16.msra.mxu0 %v653_v15  ;;  %v692_v56 = vpack.c.bf16 %v154_v55, %v153_v54  ;;  %v236_v58 = vld [vmem:[#allocation7 + $0x108] sm:$0xff]  ;;  %v237_v59 = vld [vmem:[#allocation7 + $0x110] sm:$0xff]  ;;  %v238_v61 = vld [vmem:[#allocation7 + $0x118] sm:$0xff] }
  0x21   :  { %655 = vmatprep.subr.bf16.mxu0 %v775_v1  ;;  %v695_v60 = vpack.c.bf16 %v236_v58, %v235_v57  ;;  %v698_v62 = vpack.c.bf16 %v238_v61, %v237_v59  ;;  %v239_v63 = vld [vmem:[#allocation7 + $0x120] sm:$0xff]  ;;  %v240_v0 = vld [vmem:[#allocation7 + $0x128] sm:$0xff]  ;;  %v241_v4 = vld [vmem:[#allocation7 + $0x130] sm:$0xff] }
  0x22   :  { %678 = vmatpush3.bf16.msra.mxu1 %v677_v25  ;;  %v701_v3 = vpack.c.bf16 %v240_v0, %v239_v63  ;;  %v242_v5 = vld [vmem:[#allocation7 + $0x138] sm:$0xff]  ;;  %v243_v7 = vld [vmem:[#allocation7 + $0x140] sm:$0xff]  ;;  %v244_v8 = vld [vmem:[#allocation7 + $0x148] sm:$0xff] }
  0x23   :  { %679 = vmatprep.subr.bf16.mxu1 %v775_v1  ;;  %v704_v6 = vpack.c.bf16 %v242_v5, %v241_v4  ;;  %v707_v9 = vpack.c.bf16 %v244_v8, %v243_v7  ;;  %v245_v10 = vld [vmem:[#allocation7 + $0x150] sm:$0xff]  ;;  %v246_v11 = vld [vmem:[#allocation7 + $0x158] sm:$0xff]  ;;  %v247_v13 = vld [vmem:[#allocation7 + $0x160] sm:$0xff] }
  0x24   :  { %657 = vmatpush3.bf16.msra.mxu0 %v656_v22  ;;  %v710_v12 = vpack.c.bf16 %v246_v11, %v245_v10  ;;  %v248_v14 = vld [vmem:[#allocation7 + $0x168] sm:$0xff]  ;;  %v431_v16 = vld [vmem:[%s885_s1] ss:$0 sm:$0xff]  ;;  %v249_v21 = vld [vmem:[#allocation7 + $0x170] sm:$0xff] }
  0x25   :  { %658 = vmatprep.subr.bf16.mxu0 %v775_v1  ;;  %v713_v15 = vpack.c.bf16 %v248_v14, %v247_v13  ;;  %v250_v22 = vld [vmem:[#allocation7 + $0x178] sm:$0xff]  ;;  %v331_v24 = vld [vmem:[#allocation7 + $0x180] sm:$0xff]  ;;  %v332_v25 = vld [vmem:[#allocation7 + $0x188] sm:$0xff] }
  0x26   :  { %681 = vmatpush3.bf16.msra.mxu1 %v680_v32  ;;  %v716_v23 = vpack.c.bf16 %v250_v22, %v249_v21  ;;  %v333_v26 = vld [vmem:[#allocation7 + $0x190] sm:$0xff]  ;;  %v719_v27 = vpack.c.bf16 %v332_v25, %v331_v24  ;;  %v335_v30 = vld [vmem:[#allocation7 + $0x1a0] sm:$0xff]  ;;  %v336_v31 = vld [vmem:[#allocation7 + $0x1a8] sm:$0xff] }
  0x27   :  { %682 = vmatprep.subr.bf16.mxu1 %v775_v1  ;;  %v725_v32 = vpack.c.bf16 %v336_v31, %v335_v30  ;;  %v338_v33 = vld [vmem:[#allocation7 + $0x1b8] sm:$0xff]  ;;  %v340_v36 = vld [vmem:[#allocation7 + $0x1c8] sm:$0xff]  ;;  %v341_v38 = vld [vmem:[#allocation7 + $0x1d0] sm:$0xff] }
  0x28   :  { %660 = vmatpush3.bf16.msra.mxu0 %v659_v28  ;;  %v334_v28 = vld [vmem:[#allocation7 + $0x198] sm:$0xff]  ;;  %v343_v41 = vld [vmem:[#allocation7 + $0x1e0] sm:$0xff]  ;;  %v345_v49 = vld [vmem:[#allocation7 + $0x1f0] sm:$0xff] }
  0x29   :  { %661 = vmatprep.subr.bf16.mxu0 %v775_v1  ;;  %v722_v29 = vpack.c.bf16 %v334_v28, %v333_v26  ;;  %v433_v44 = vld [vmem:[%s885_s1 + $0x1] ss:$0 sm:$0xff] }
  0x2a   :  { %684 = vmatpush3.bf16.msra.mxu1 %v683_v39  ;;  %v342_v39 = vld [vmem:[#allocation7 + $0x1d8] sm:$0xff] }
  0x2b   :  { %685 = vmatprep.subr.bf16.mxu1 %v775_v1  ;;  %v734_v40 = vpack.c.bf16 %v342_v39, %v341_v38 }
  0x2c   :  { %663 = vmatpush3.bf16.msra.mxu0 %v662_v35  ;;  %v339_v35 = vld [vmem:[#allocation7 + $0x1c0] sm:$0xff] }
  0x2d   :  { %664 = vmatprep.subr.bf16.mxu0 %v775_v1  ;;  %v731_v37 = vpack.c.bf16 %v340_v36, %v339_v35 }
  0x2e   :  { %687 = vmatpush3.bf16.msra.mxu1 %v686_v47 }
  0x2f   :  { %688 = vmatprep.subr.bf16.mxu1 %v775_v1 }
  0x30   :  { %666 = vmatpush3.bf16.msra.mxu0 %v665_v42  ;;  %v344_v42 = vld [vmem:[#allocation7 + $0x1e8] sm:$0xff] }
  0x31   :  { %667 = vmatprep.subr.bf16.mxu0 %v775_v1  ;;  %v737_v43 = vpack.c.bf16 %v344_v42, %v343_v41 }
  0x32   :  { %690 = vmatpush3.bf16.msra.mxu1 %v689_v52  ;;  %v435_v52 = vld [vmem:[%s885_s1 + $0x2] ss:$0 sm:$0xff] }
  0x33   :  { %691 = vmatprep.subr.bf16.mxu1 %v775_v1 }
  0x34   :  { %669 = vmatpush3.bf16.msra.mxu0 %v668_v50  ;;  %v346_v50 = vld [vmem:[#allocation7 + $0x1f8] sm:$0xff] }
  0x35   :  { %694 = vmatprep.subr.bf16.mxu0 %v775_v1  ;;  %v740_v51 = vpack.c.bf16 %v346_v50, %v345_v49 }
  0x36   :  { %693 = vmatpush3.bf16.msra.mxu1 %v692_v56  ;;  %v437_v56 = vld [vmem:[%s885_s1 + $0x3] ss:$0 sm:$0xff] }
  0x37   :  { %539 = vmatmul.mubr.f32.vlgmr.msra.gmra.mrb[0].mxu0 %v40_v53  ;;  %718 = vmatprep.subr.bf16.mxu1 %v775_v1 }
  0x38   :  { %608 = vmatprep.mubr.msk.f32.mxu0 %vm776_vm0, %v777_v2  ;;  %696 = vmatpush3.bf16.msra.mxu0 %v695_v60 }
  0x39   :  { %697 = vmatprep.subr.bf16.mxu0 %v775_v1 }
  0x3c   :  { %699 = vmatpush3.bf16.msra.mxu0 %v698_v62 }
  0x3d   :  { %700 = vmatprep.subr.bf16.mxu0 %v775_v1 }
  0x40   :  { %702 = vmatpush3.bf16.msra.mxu0 %v701_v3 }
  0x41   :  { %703 = vmatprep.subr.bf16.mxu0 %v775_v1 }
  0x44   :  { %705 = vmatpush3.bf16.msra.mxu0 %v704_v6 }
  0x45   :  { %706 = vmatprep.subr.bf16.mxu0 %v775_v1 }
  0x48   :  { %708 = vmatpush3.bf16.msra.mxu0 %v707_v9 }
  0x49   :  { %709 = vmatprep.subr.bf16.mxu0 %v775_v1 }
  0x4c   :  { %711 = vmatpush3.bf16.msra.mxu0 %v710_v12 }
  0x4d   :  { %712 = vmatprep.subr.bf16.mxu0 %v775_v1 }
  0x50   :  { %714 = vmatpush3.bf16.msra.mxu0 %v713_v15 }
  0x51   :  { %715 = vmatprep.subr.bf16.mxu0 %v775_v1 }
  0x54   :  { %717 = vmatpush3.bf16.msra.mxu0 %v716_v23 }
 0x10a   :  { %v133_v17 = vpop.f32.mrb[0].mxu0 }
 0x10b   :  { %v134_v18 = vadd.f32 %v431_v16, %v133_v17  ;;  %v540_v19 = vpop.f32.mrb[1].mxu0 }
 0x10d   :  { %v137_v20 = vmax.f32 %v134_v18, 0.0 }
 0x10f   :  { %574 = vmatmul.mubr.f32.vlgmr.msra.gmra.mrb[0].mxu1 %v137_v20 }
 0x110   :  { %643 = vmatprep.mubr.msk.f32.mxu1 %vm776_vm0, %v777_v2  ;;  %720 = vmatpush3.bf16.msra.mxu1 %v719_v27  ;;  %v337_v2 = vld [vmem:[#allocation7 + $0x1b0] sm:$0xff] }
 0x111   :  { %721 = vmatprep.subr.bf16.mxu1 %v775_v1  ;;  %v728_v34 = vpack.c.bf16 %v338_v33, %v337_v2 }
 0x114   :  { %723 = vmatpush3.bf16.msra.mxu1 %v722_v29 }
 0x115   :  { %724 = vmatprep.subr.bf16.mxu1 %v775_v1 }
 0x118   :  { %726 = vmatpush3.bf16.msra.mxu1 %v725_v32 }
 0x119   :  { %727 = vmatprep.subr.bf16.mxu1 %v775_v1 }
 0x11c   :  { %729 = vmatpush3.bf16.msra.mxu1 %v728_v34 }
 0x11d   :  { %730 = vmatprep.subr.bf16.mxu1 %v775_v1 }
 0x120   :  { %732 = vmatpush3.bf16.msra.mxu1 %v731_v37 }
 0x121   :  { %733 = vmatprep.subr.bf16.mxu1 %v775_v1 }
 0x124   :  { %735 = vmatpush3.bf16.msra.mxu1 %v734_v40 }
 0x125   :  { %736 = vmatprep.subr.bf16.mxu1 %v775_v1 }
 0x128   :  { %738 = vmatpush3.bf16.msra.mxu1 %v737_v43 }
 0x129   :  { %739 = vmatprep.subr.bf16.mxu1 %v775_v1 }
 0x12c   :  { %741 = vmatpush3.bf16.msra.mxu1 %v740_v51 }
 0x1e2   :  { %v229_v45 = vpop.f32.mrb[0].mxu1 }
 0x1e3   :  { %v230_v46 = vadd.f32 %v433_v44, %v229_v45  ;;  %v575_v47 = vpop.f32.mrb[1].mxu1 }
 0x1e5   :  { %v233_v48 = vmax.f32 %v230_v46, 0.0 }
 0x1e7   :  { %609 = vmatmul.mubr.f32.vlgmr.msra.gmra.mrb[2].mxu0 %v233_v48 }
 0x2ba   :  { %v325_v53 = vpop.f32.mrb[2].mxu0 }
 0x2bb   :  { %v326_v54 = vadd.f32 %v435_v52, %v325_v53  ;;  %v610_v1 = vpop.f32.mrb[3].mxu0 }
 0x2bd   :  { %v329_v55 = vmax.f32 %v326_v54, 0.0 }
 0x2bf   :  { %644 = vmatmul.mubr.f32.vlgmr.msra.gmra.mrb[2].mxu1 %v329_v55 }
 0x392   :  { %v421_v57 = vpop.f32.mrb[2].mxu1 }
 0x393   :  { %v422_v58 = vadd.f32 %v437_v56, %v421_v57  ;;  %v645_v59 = vpop.f32.mrb[3].mxu1 }
 0x395   :  { %425 = vst [vmem:[%s888_s4] sm:$0xff] %v422_v58 }
 0x396   :  { %430 = vsyncpa [#allocation8], 1 }

</bundles_post_ra>
